<compile_context>
chip_gen: v5e
topology: v5e:2x2
jax: 0.10.0
libtpu: 0.0.40
codegen_flags: <defaults>
</compile_context>

<pallas_src>
import jax
import jax.numpy as jnp
from jax.experimental import pallas as pl
from jax.experimental.pallas import tpu as pltpu


_INV_SQRT2 = 0.7071067811865476  # 1/sqrt(2), hoisted python literal


def _round_up(v, m):
    return (v + m - 1) // m * m


def _cdiv(a, b):
    return -(-a // b)


def _vmem_capacity_bytes():
    """Physical VMEM per TensorCore; conservative fallback if query fails."""
    try:
        cap = int(getattr(pltpu.get_tpu_info(), "vmem_capacity_bytes", 0))
        if cap > 0:
            return cap
    except Exception:
        pass
    return 64 * 1024 * 1024  # v7x-sized fallback: safe on every generation


# ---------------------------------------------------------------------------
# Kernels
# ---------------------------------------------------------------------------
def _mlp_resident_kernel(x_ref, w1_ref, b1_ref, w2_ref, b2_ref, o_ref):
    """One row-tile step with VMEM-resident W1/W2 (fetched once for the grid)."""
    # fc1: bf16 operands, f32 accumulation on the MXU; bias add in f32.
    h = jnp.dot(x_ref[...], w1_ref[...], preferred_element_type=jnp.float32)
    h = h + b1_ref[...]
    # exact erf-GELU (matches torch.nn.GELU default); elementwise kept in f32.
    h = 0.5 * h * (1.0 + jax.lax.erf(h * _INV_SQRT2))
    # dropout p=0.0 is the identity -> nothing to do.
    # TODO(synk): training-mode dropout (p>0) would need pltpu.prng_*.
    o = jnp.dot(h.astype(w2_ref.dtype), w2_ref[...],
                preferred_element_type=jnp.float32) + b2_ref[...]
    o_ref[...] = o.astype(o_ref.dtype)


def _mlp_streaming_kernel(x_ref, w1_ref, b1_ref, w2_ref, b2_ref, o_ref, acc_ref):
    """(row-tile, hidden-tile) step; hidden axis is the fc2 reduction (P3)."""
    k = pl.program_id(1)

    @pl.when(k == 0)
    def _():
        acc_ref[...] = jnp.zeros_like(acc_ref)

    h = jnp.dot(x_ref[...], w1_ref[...], preferred_element_type=jnp.float32)
    h = h + b1_ref[...]
    h = 0.5 * h * (1.0 + jax.lax.erf(h * _INV_SQRT2))
    acc_ref[...] += jnp.dot(h.astype(w2_ref.dtype), w2_ref[...],
                            preferred_element_type=jnp.float32)

    @pl.when(k == pl.num_programs(1) - 1)
    def _():
        o_ref[...] = (acc_ref[...] + b2_ref[...]).astype(o_ref.dtype)


# ---------------------------------------------------------------------------
# Wrapper
# ---------------------------------------------------------------------------
def _pad_cast_2d(a, rows, cols, dtype):
    """Zero-pad `a` to (rows, cols) and cast; skip copies if already aligned."""
    r, c = a.shape
    if (r, c) == (rows, cols):
        return a if a.dtype == dtype else a.astype(dtype)
    buf = jnp.zeros((rows, cols), dtype)
    return buf.at[:r, :c].set(a.astype(dtype))


def mlp_forward(x, w1, b1, w2, b2, *, block_m=1024, block_h=512,
                compute_dtype=jnp.bfloat16):
    """x: (B, N, Cin) -> (B, N, Cout). Fused fc1 + GELU + fc2 Pallas kernel."""
    B, N, Cin = x.shape
    Cin_w, H = w1.shape
    H_w, Cout = w2.shape
    assert Cin_w == Cin and H_w == H
    M = B * N
    out_dtype = x.dtype
    out_sz = jnp.dtype(out_dtype).itemsize
    cd = jnp.dtype(compute_dtype).itemsize

    # Lane-dense feature dims (multiples of 128): unmasked vst, full MXU lanes.
    cin_p = _round_up(Cin, 128)
    cout_p = _round_up(Cout, 128)
    h_128 = _round_up(H, 128)

    # Generation-aware VMEM budget (v5e/v6e: 128 MiB, v7x: 64 MiB per core).
    vmem_cap = _vmem_capacity_bytes()
    vmem_limit = int(vmem_cap * 0.85)
    vmem_budget = int(vmem_cap * 0.70)

    # Row tile: multiple of 256 (MXU) when capped by block_m, multiple of 16
    # (bf16 sublane packing) always; balanced so the last tile isn't mostly pad.
    m16 = _round_up(M, 16)
    if m16 <= block_m:
        tm = m16
    else:
        n_tiles = _cdiv(m16, block_m)
        tm = _round_up(_cdiv(m16, n_tiles), 256)

    # ----------------------- weight-resident fast path ----------------------
    def resident_vmem(tm_):
        return (2 * tm_ * cin_p * cd           # x tile (double-buffered)
                + 2 * cin_p * h_128 * cd       # W1 (conservatively count 2 bufs)
                + 2 * h_128 * 4                # b1
                + 2 * h_128 * cout_p * cd      # W2
                + 2 * cout_p * 4               # b2
                + 2 * tm_ * cout_p * out_sz    # out tile (double-buffered)
                + tm_ * h_128 * (4 + cd))      # f32 hidden + its bf16 cast

    tm_res = tm
    while resident_vmem(tm_res) > vmem_budget and tm_res > 256:
        tm_res = max(256, _round_up(tm_res // 2, 16))
    use_resident = resident_vmem(tm_res) <= vmem_budget

    if use_resident:
        tm = tm_res
        h_p = h_128
        m_p = _round_up(M, tm)

        x_p = _pad_cast_2d(x.reshape(M, Cin), m_p, cin_p, compute_dtype)
        w1_p = _pad_cast_2d(w1, cin_p, h_p, compute_dtype)
        b1_p = _pad_cast_2d(b1.reshape(1, H), 1, h_p, jnp.float32)
        w2_p = _pad_cast_2d(w2, h_p, cout_p, compute_dtype)
        b2_p = _pad_cast_2d(b2.reshape(1, Cout), 1, cout_p, jnp.float32)

        grid = (m_p // tm,)
        flops = 2 * m_p * cin_p * h_p + 2 * m_p * h_p * cout_p
        bytes_accessed = (m_p * cin_p * cd + cin_p * h_p * cd
                          + h_p * cout_p * cd + (h_p + cout_p) * 4
                          + m_p * cout_p * out_sz)

        out = pl.pallas_call(
            _mlp_resident_kernel,
            out_shape=jax.ShapeDtypeStruct((m_p, cout_p), out_dtype),
            grid_spec=pltpu.PrefetchScalarGridSpec(
                num_scalar_prefetch=0,
                grid=grid,
                in_specs=[
                    pl.BlockSpec((tm, cin_p), lambda i: (i, 0)),    # x row tile
                    pl.BlockSpec((cin_p, h_p), lambda i: (0, 0)),   # W1 resident
                    pl.BlockSpec((1, h_p), lambda i: (0, 0)),       # b1 resident
                    pl.BlockSpec((h_p, cout_p), lambda i: (0, 0)),  # W2 resident
                    pl.BlockSpec((1, cout_p), lambda i: (0, 0)),    # b2 resident
                ],
                out_specs=pl.BlockSpec((tm, cout_p), lambda i: (i, 0)),
            ),
            compiler_params=pltpu.CompilerParams(
                dimension_semantics=("parallel",),
                vmem_limit_bytes=vmem_limit,
            ),
            cost_estimate=pl.CostEstimate(
                flops=flops, transcendentals=m_p * h_p,
                bytes_accessed=bytes_accessed),
        )(x_p, w1_p, b1_p, w2_p, b2_p)

        return out[:M, :Cout].reshape(B, N, Cout)

    # ------------------- streaming fallback (huge H / dims) -----------------
    th = min(_round_up(block_h, 128), h_128)

    def streaming_vmem(tm_, th_):
        stream = 2 * (tm_ * cin_p * cd + cin_p * th_ * cd + th_ * 4
                      + th_ * cout_p * cd + cout_p * 4 + tm_ * cout_p * out_sz)
        scratch = tm_ * cout_p * 4 + tm_ * th_ * (4 + cd)
        return stream + scratch

    # Shrink hidden tile first (preserves arithmetic intensity ~ tm) ...
    while streaming_vmem(tm, th) > vmem_budget and th > 256:
        th = max(256, _round_up(th // 2, 128))
    # ... then the row tile, keeping it MXU-friendly (>= 256) ...
    while streaming_vmem(tm, th) > vmem_budget and tm > 256:
        tm = max(256, _round_up(tm // 2, 16))
    # ... last-resort safety floors so we never exceed VMEM on any chip.
    while streaming_vmem(tm, th) > vmem_budget and th > 128:
        th = max(128, th // 2)
    while streaming_vmem(tm, th) > vmem_budget and tm > 16:
        tm = max(16, _round_up(tm // 2, 16))

    m_p = _round_up(M, tm)
    h_p = _round_up(h_128, th)

    x_p = _pad_cast_2d(x.reshape(M, Cin), m_p, cin_p, compute_dtype)
    w1_p = _pad_cast_2d(w1, cin_p, h_p, compute_dtype)
    b1_p = _pad_cast_2d(b1.reshape(1, H), 1, h_p, jnp.float32)
    w2_p = _pad_cast_2d(w2, h_p, cout_p, compute_dtype)
    b2_p = _pad_cast_2d(b2.reshape(1, Cout), 1, cout_p, jnp.float32)

    grid = (m_p // tm, h_p // th)
    n_row_tiles = grid[0]
    flops = 2 * m_p * cin_p * h_p + 2 * m_p * h_p * cout_p
    # Weights are re-streamed once per row tile in this scheme.
    bytes_accessed = (m_p * cin_p * cd
                      + n_row_tiles * (cin_p * h_p + h_p * cout_p) * cd
                      + (h_p + cout_p) * 4 + m_p * cout_p * out_sz)

    out = pl.pallas_call(
        _mlp_streaming_kernel,
        out_shape=jax.ShapeDtypeStruct((m_p, cout_p), out_dtype),
        grid_spec=pltpu.PrefetchScalarGridSpec(
            num_scalar_prefetch=0,
            grid=grid,
            in_specs=[
                pl.BlockSpec((tm, cin_p), lambda i, k: (i, 0)),   # x row tile
                pl.BlockSpec((cin_p, th), lambda i, k: (0, k)),   # W1 hidden slice
                pl.BlockSpec((1, th), lambda i, k: (0, k)),       # b1 hidden slice
                pl.BlockSpec((th, cout_p), lambda i, k: (k, 0)),  # W2 hidden slice
                pl.BlockSpec((1, cout_p), lambda i, k: (0, 0)),   # b2
            ],
            out_specs=pl.BlockSpec((tm, cout_p), lambda i, k: (i, 0)),
            scratch_shapes=[pltpu.VMEM((tm, cout_p), jnp.float32)],
        ),
        compiler_params=pltpu.CompilerParams(
            dimension_semantics=("parallel", "arbitrary"),
            vmem_limit_bytes=vmem_limit,
        ),
        cost_estimate=pl.CostEstimate(
            flops=flops, transcendentals=m_p * h_p,
            bytes_accessed=bytes_accessed),
    )(x_p, w1_p, b1_p, w2_p, b2_p)

    return out[:M, :Cout].reshape(B, N, Cout)


def init_params(key, in_features, hidden_features, out_features):
    """Deterministic init mimicking nn.Linear default (uniform +/- 1/sqrt(fan_in))."""
    k1, k2, k3, k4 = jax.random.split(key, 4)
    lim1 = 1.0 / jnp.sqrt(in_features)
    lim2 = 1.0 / jnp.sqrt(hidden_features)
    w1 = jax.random.uniform(k1, (in_features, hidden_features), jnp.float32, -lim1, lim1)
    b1 = jax.random.uniform(k2, (hidden_features,), jnp.float32, -lim1, lim1)
    w2 = jax.random.uniform(k3, (hidden_features, out_features), jnp.float32, -lim2, lim2)
    b2 = jax.random.uniform(k4, (out_features,), jnp.float32, -lim2, lim2)
    return w1, b1, w2, b2


if __name__ == "__main__":
    key = jax.random.PRNGKey(0)
    kx, kp = jax.random.split(key)

    # Small shapes consistent with the module's forward: tokens (B, N, C)
    B, N = 2, 8
    in_features, hidden_features, out_features = 32, 64, 32

    x = jax.random.normal(kx, (B, N, in_features), jnp.float32)
    w1, b1, w2, b2 = init_params(kp, in_features, hidden_features, out_features)

    y = mlp_forward(x, w1, b1, w2, b2)
    y = jax.block_until_ready(y)

    # reference in plain f32 JAX (torch semantics: exact GELU, dropout p=0 identity)
    h_ref = jax.nn.gelu(x @ w1 + b1, approximate=False)
    y_ref = h_ref @ w2 + b2
    assert y.shape == (B, N, out_features)
    # bf16 matmul operands with f32 accumulation -> looser tolerance vs f32 reference
    max_err = float(jnp.max(jnp.abs(y - y_ref)))
    assert jnp.allclose(y, y_ref, atol=5e-2, rtol=5e-2), f"max abs err {max_err}"

    print("KERNEL_OK")
</pallas_src>

<mosaic_0001>
module attributes {stable_mosaic.version = 11 : i64} {
  func.func @_mlp_resident_kernel(%arg0: i32, %arg1: memref<16x128xbf16, #tpu.memory_space<vmem>>, %arg2: memref<128x128xbf16, #tpu.memory_space<vmem>>, %arg3: memref<1x128xf32, #tpu.memory_space<vmem>>, %arg4: memref<128x128xbf16, #tpu.memory_space<vmem>>, %arg5: memref<1x128xf32, #tpu.memory_space<vmem>>, %arg6: memref<16x128xf32, #tpu.memory_space<vmem>>) attributes {dimension_semantics = [#tpu.dimension_semantics<parallel>], iteration_bounds = array<i64: 1>, scalar_prefetch = 0 : i64, scratch_operands = 0 : i64, tpu.core_type = #tpu.core_type<tc>, window_params = [{transform_indices = @transform_0, window_bounds = array<i64: 16, 128>}, {pipeline_mode = #tpu.pipeline_mode<synchronous>, transform_indices = @transform_1, window_bounds = array<i64: 128, 128>}, {pipeline_mode = #tpu.pipeline_mode<synchronous>, transform_indices = @transform_2, window_bounds = array<i64: 1, 128>}, {pipeline_mode = #tpu.pipeline_mode<synchronous>, transform_indices = @transform_3, window_bounds = array<i64: 128, 128>}, {pipeline_mode = #tpu.pipeline_mode<synchronous>, transform_indices = @transform_4, window_bounds = array<i64: 1, 128>}, {transform_indices = @transform_5, window_bounds = array<i64: 16, 128>}]} {
    %c0 = arith.constant 0 : index
    %c0_0 = arith.constant 0 : index
    %0 = vector.load %arg1[%c0, %c0_0] : memref<16x128xbf16, #tpu.memory_space<vmem>>, vector<16x128xbf16>
    %c0_1 = arith.constant 0 : index
    %c0_2 = arith.constant 0 : index
    %1 = vector.load %arg2[%c0_1, %c0_2] : memref<128x128xbf16, #tpu.memory_space<vmem>>, vector<128x128xbf16>
    %cst = arith.constant dense<0.000000e+00> : vector<16x128xf32>
    %2 = tpu.matmul %0, %1, %cst {dimension_numbers = #tpu.dot_dimension_numbers<[1], [0], [0], [1], [0, 0, 1, 1], [], []>} : vector<16x128xbf16>, vector<128x128xbf16>, vector<16x128xf32> -> vector<16x128xf32>
    %c0_3 = arith.constant 0 : index
    %c0_4 = arith.constant 0 : index
    %3 = vector.load %arg3[%c0_3, %c0_4] : memref<1x128xf32, #tpu.memory_space<vmem>>, vector<1x128xf32>
    %4 = vector.broadcast %3 : vector<1x128xf32> to vector<16x128xf32>
    %5 = arith.addf %2, %4 : vector<16x128xf32>
    %cst_5 = arith.constant 5.000000e-01 : f32
    %6 = vector.broadcast %cst_5 : f32 to vector<16x128xf32>
    %7 = arith.mulf %6, %5 : vector<16x128xf32>
    %cst_6 = arith.constant 0.707106769 : f32
    %8 = vector.broadcast %cst_6 : f32 to vector<16x128xf32>
    %9 = arith.mulf %5, %8 : vector<16x128xf32>
    %10 = math.erf %9 : vector<16x128xf32>
    %cst_7 = arith.constant 1.000000e+00 : f32
    %11 = vector.broadcast %cst_7 : f32 to vector<16x128xf32>
    %12 = arith.addf %11, %10 : vector<16x128xf32>
    %13 = arith.mulf %7, %12 : vector<16x128xf32>
    %14 = arith.truncf %13 : vector<16x128xf32> to vector<16x128xbf16>
    %c0_8 = arith.constant 0 : index
    %c0_9 = arith.constant 0 : index
    %15 = vector.load %arg4[%c0_8, %c0_9] : memref<128x128xbf16, #tpu.memory_space<vmem>>, vector<128x128xbf16>
    %cst_10 = arith.constant dense<0.000000e+00> : vector<16x128xf32>
    %16 = tpu.matmul %14, %15, %cst_10 {dimension_numbers = #tpu.dot_dimension_numbers<[1], [0], [0], [1], [0, 0, 1, 1], [], []>} : vector<16x128xbf16>, vector<128x128xbf16>, vector<16x128xf32> -> vector<16x128xf32>
    %c0_11 = arith.constant 0 : index
    %c0_12 = arith.constant 0 : index
    %17 = vector.load %arg5[%c0_11, %c0_12] : memref<1x128xf32, #tpu.memory_space<vmem>>, vector<1x128xf32>
    %18 = vector.broadcast %17 : vector<1x128xf32> to vector<16x128xf32>
    %19 = arith.addf %16, %18 : vector<16x128xf32>
    %c0_13 = arith.constant 0 : index
    %c0_14 = arith.constant 0 : index
    %20 = vector.load %arg6[%c0_13, %c0_14] : memref<16x128xf32, #tpu.memory_space<vmem>>, vector<16x128xf32>
    tpu.vector_store %arg6[%c0_13, %c0_14], %19 {strides = array<i32>} : memref<16x128xf32, #tpu.memory_space<vmem>>, vector<16x128xf32>,
    return
  }
  func.func @transform_0(%arg0: i32) -> (i32, i32) {
    %c0_i32 = arith.constant 0 : i32
    %c0_i32_0 = arith.constant 0 : i32
    return %arg0, %c0_i32 : i32, i32
  }
  func.func @transform_1(%arg0: i32) -> (i32, i32) {
    %c0_i32 = arith.constant 0 : i32
    %c0_i32_0 = arith.constant 0 : i32
    %c0_i32_1 = arith.constant 0 : i32
    return %c0_i32, %c0_i32_0 : i32, i32
  }
  func.func @transform_2(%arg0: i32) -> (i32, i32) {
    %c0_i32 = arith.constant 0 : i32
    %c0_i32_0 = arith.constant 0 : i32
    %c0_i32_1 = arith.constant 0 : i32
    return %c0_i32, %c0_i32_0 : i32, i32
  }
  func.func @transform_3(%arg0: i32) -> (i32, i32) {
    %c0_i32 = arith.constant 0 : i32
    %c0_i32_0 = arith.constant 0 : i32
    %c0_i32_1 = arith.constant 0 : i32
    return %c0_i32, %c0_i32_0 : i32, i32
  }
  func.func @transform_4(%arg0: i32) -> (i32, i32) {
    %c0_i32 = arith.constant 0 : i32
    %c0_i32_0 = arith.constant 0 : i32
    %c0_i32_1 = arith.constant 0 : i32
    return %c0_i32, %c0_i32_0 : i32, i32
  }
  func.func @transform_5(%arg0: i32) -> (i32, i32) {
    %c0_i32 = arith.constant 0 : i32
    %c0_i32_0 = arith.constant 0 : i32
    return %arg0, %c0_i32 : i32, i32
  }
}

</mosaic_0001>

<bundles_post_ra>
// kernel: tpu_custom_call.1
= control target key start
LH: loop header
LB: loop body
LE: loop exit
PB: predicated region body
PF: predicated region fallthrough
CT: control target
= control target key end

     0   :  { %10 = vsyncpa [#allocation3], 0  ;;  %s628_s0 = inlined_call_operand.hbm [shape: bf16[16,128], index: 0, kind: input, shape index: {}]   ;;  %s629_s1 = inlined_call_operand.hbm [shape: bf16[128,128], index: 1, kind: input, shape index: {}]   ;;  %s630_s2 = inlined_call_operand.vmem [shape: f32[1,128], index: 2, kind: input, shape index: {}]   ;;  %s631_s3 = inlined_call_operand.hbm [shape: bf16[128,128], index: 3, kind: input, shape index: {}]   ;;  %s632_s4 = inlined_call_operand.vmem [shape: f32[1,128], index: 4, kind: input, shape index: {}]   ;;  %s633_s5 = inlined_call_operand.hbm [shape: f32[16,128], index: 5, kind: output, shape index: {}]  }
   0x1   :  { %11 = vsyncpa [#allocation6], 0 }
   0x2   :  { %12 = vsyncpa [#allocation4], 0  ;;  %s30_s20 = sshll.u32 %s629_s1, 4  ;;  %s554_s21 = smov [#allocation5]   ;;  %s31_s20 = int_to_ptr.hbm [resolvable:$true] %s30_s20 }
   0x3   :  { %s32_s22 = sshll.u32 %s554_s21, 4  ;;  %s17_s25 = sshll.u32 %s628_s0, 4  ;;  %s33_s22 = int_to_ptr.vmem [resolvable:$true] %s32_s22  ;;  %s18_s25 = int_to_ptr.hbm [resolvable:$true] %s17_s25 }
   0x4   :  { %s555_s26 = smov 64   ;;  %s556_s27 = smov 4  }
   0x5   :  { %38 = dma.hbm_to_vmem [thread:$0]  %s31_s20, 1024, %s33_s22, [#allocation6], %s555_s26, %s555_s26, %s556_s27  }
   0x6   :  { %s557_s28 = smov [#allocation2]   ;;  %s45_s7 = sshll.u32 %s631_s3, 4  ;;  %s46_s7 = int_to_ptr.hbm [resolvable:$true] %s45_s7 }
   0x7   :  { %s19_s29 = sshll.u32 %s557_s28, 4  ;;  %s558_s1 = smov [#allocation7]   ;;  %s20_s29 = int_to_ptr.vmem [resolvable:$true] %s19_s29 }
   0x8   :  { %25 = dma.hbm_to_vmem [thread:$0]  %s18_s25, 128, %s20_s29, [#allocation3], %s555_s26, %s555_s26, %s556_s27  }
   0x9   :  { %s47_s8 = sshll.u32 %s558_s1, 4  ;;  %s48_s8 = int_to_ptr.vmem [resolvable:$true] %s47_s8 }
   0xa   :  { %53 = dma.hbm_to_vmem [thread:$0]  %s46_s7, 1024, %s48_s8, [#allocation6], %s555_s26, %s555_s26, %s556_s27  }
   0xb   :  { %548 = dma.done.wait [#allocation3], 128  }
   0xc   :  { %549 = vsyncadd [#allocation3], 4294967168 }
   0xd   :  { %550 = dma.done.wait [#allocation6], 2048  }
   0xe   :  { %551 = vsyncadd [#allocation6], 4294965248  ;;  %v429_v0 = vld [vmem:[#allocation5 + $0x38] sm:$0xff]  ;;  %v428_v1 = vld [vmem:[#allocation5 + $0x30] sm:$0xff]  ;;  %s559_s10 = smov [#allocation8]   ;;  %s337_s14 = sshll.u32 %s633_s5, 4  ;;  %s338_s14 = int_to_ptr.hbm [resolvable:$true] %s337_s14 }
   0xf   :  { %144 = vmatpush.bf16.msra.mxu0 %v429_v0  ;;  %v427_v2 = vld [vmem:[#allocation5 + $0x28] sm:$0xff]  ;;  %v426_v3 = vld [vmem:[#allocation5 + $0x20] sm:$0xff]  ;;  %v425_v4 = vld [vmem:[#allocation5 + $0x18] sm:$0xff]  ;;  %s335_s11 = sshll.u32 %s559_s10, 4  ;;  %s560_s15 = smov 128   ;;  %s336_s11 = int_to_ptr.vmem [resolvable:$true] %s335_s11 }
  0x10   :  { %v424_v5 = vld [vmem:[#allocation5 + $0x10] sm:$0xff]  ;;  %v423_v6 = vld [vmem:[#allocation5 + $0x8] sm:$0xff]  ;;  %v422_v7 = vld [vmem:[#allocation5] sm:$0xff]  ;;  %s561_s16 = smov 8  }
  0x11   :  { %v421_v8 = vld [vmem:[#allocation2] sm:$0xff]  ;;  %v436_v14 = vld [vmem:[#allocation7 + $0x30] sm:$0xff]  ;;  %v435_v16 = vld [vmem:[#allocation7 + $0x28] sm:$0xff] }
  0x12   :  { %v446_v9 = vld [vmem:[%s630_s2] ss:$0 sm:$0xff]  ;;  %v434_v21 = vld [vmem:[#allocation7 + $0x20] sm:$0xff]  ;;  %v432_v33 = vld [vmem:[#allocation7 + $0x10] sm:$0xff] }
  0x13   :  { %145 = vmatpush.bf16.msra.mxu0 %v428_v1  ;;  %v437_v10 = vld [vmem:[#allocation7 + $0x38] sm:$0xff]  ;;  %v431_v41 = vld [vmem:[#allocation7 + $0x8] sm:$0xff]  ;;  %v430_v48 = vld [vmem:[#allocation7] sm:$0xff] }
  0x14   :  { %315 = vmatpush.bf16.msra.mxu1 %v437_v10  ;;  %v433_v27 = vld [vmem:[#allocation7 + $0x18] sm:$0xff] }
  0x17   :  { %146 = vmatpush.bf16.msra.mxu0 %v427_v2 }
  0x18   :  { %316 = vmatpush.bf16.msra.mxu1 %v436_v14 }
  0x1b   :  { %147 = vmatpush.bf16.msra.mxu0 %v426_v3 }
  0x1c   :  { %317 = vmatpush.bf16.msra.mxu1 %v435_v16 }
  0x1f   :  { %148 = vmatpush.bf16.msra.mxu0 %v425_v4 }
  0x20   :  { %318 = vmatpush.bf16.msra.mxu1 %v434_v21 }
  0x23   :  { %149 = vmatpush.bf16.msra.mxu0 %v424_v5 }
  0x24   :  { %319 = vmatpush.bf16.msra.mxu1 %v433_v27 }
  0x27   :  { %150 = vmatpush.bf16.msra.mxu0 %v423_v6 }
  0x28   :  { %320 = vmatpush.bf16.msra.mxu1 %v432_v33 }
  0x2b   :  { %151 = vmatpush.bf16.msra.mxu0 %v422_v7 }
  0x2c   :  { %321 = vmatpush.bf16.msra.mxu1 %v431_v41 }
  0x2e   :  { %152 = vmatmul.bf16.vlgmr.msra.gmra.mxu0 %v421_v8 }
  0x30   :  { %322 = vmatpush.bf16.msra.mxu1 %v430_v48 }
  0xab   :  { %v153_v11 = vpop.f32.mrf.mxu0 }
  0xac   :  { %v604_v12 = vadd.f32 %v446_v9, %v153_v11 }
  0xae   :  { %v607_v13 = vmul.f32 0.70710677, %v604_v12 }
  0xb0   :  { %v162_v15 = vmul.f32 %v607_v13, %v607_v13 }
  0xb2   :  { %v163_v17 = vmin.f32 %v162_v15, 16.0 }
  0xb3   :  { %v155_v18 = vpop.f32.mrf.mxu0 }
  0xb4   :  { %v164_v19 = vmul.f32 2.1237322e-06, %v163_v17  ;;  %v611_v20 = vadd.f32 %v446_v9, %v155_v18  ;;  %v175_v22 = vmul.f32 3.8918573e-05, %v163_v17 }
  0xb6   :  { %v165_v23 = vadd.f32 0.00028619796, %v164_v19  ;;  %v614_v24 = vmul.f32 0.70710677, %v611_v20  ;;  %v176_v25 = vadd.f32 0.001143296, %v175_v22 }
  0xb8   :  { %v202_v26 = vmul.f32 %v614_v24, %v614_v24  ;;  %v166_v28 = vmul.f32 %v165_v23, %v163_v17  ;;  %v177_v29 = vmul.f32 %v176_v25, %v163_v17 }
  0xba   :  { %v203_v30 = vmin.f32 %v202_v26, 16.0  ;;  %v178_v31 = vadd.f32 0.014752088, %v177_v29  ;;  %v167_v35 = vadd.f32 0.0036580483, %v166_v28 }
  0xbc   :  { %v204_v32 = vmul.f32 2.1237322e-06, %v203_v30  ;;  %v215_v34 = vmul.f32 3.8918573e-05, %v203_v30  ;;  %v179_v36 = vmul.f32 %v178_v31, %v163_v17  ;;  %v168_v43 = vmul.f32 %v167_v35, %v163_v17 }
  0xbd   :  { %v159_v35 = vmul.f32 0.5, %v611_v20 }
  0xbe   :  { %v205_v37 = vadd.f32 0.00028619796, %v204_v32  ;;  %v216_v38 = vadd.f32 0.001143296, %v215_v34  ;;  %v180_v39 = vadd.f32 0.112945676, %v179_v36 }
  0xbf   :  { %v169_v50 = vadd.f32 0.05243302, %v168_v43  ;;  %v158_v34 = vmul.f32 0.5, %v604_v12 }
  0xc0   :  { %v206_v40 = vmul.f32 %v205_v37, %v203_v30  ;;  %v217_v42 = vmul.f32 %v216_v38, %v203_v30  ;;  %v181_v44 = vmul.f32 %v180_v39, %v163_v17 }
  0xc1   :  { %v170_v56 = vmul.f32 %v169_v50, %v163_v17 }
  0xc2   :  { %v207_v45 = vadd.f32 0.0036580483, %v206_v40  ;;  %v218_v46 = vadd.f32 0.014752088, %v217_v42  ;;  %v182_v47 = vadd.f32 0.4994258, %v181_v44 }
  0xc3   :  { %v171_v60 = vadd.f32 0.18741608, %v170_v56 }
  0xc4   :  { %v219_v49 = vmul.f32 %v218_v46, %v203_v30  ;;  %v183_v51 = vmul.f32 %v182_v47, %v163_v17  ;;  %v208_v52 = vmul.f32 %v207_v45, %v203_v30 }
  0xc5   :  { %v172_v1 = vmul.f32 %v171_v60, %v163_v17 }
  0xc6   :  { %v220_v53 = vadd.f32 0.112945676, %v219_v49  ;;  %v184_v54 = vadd.f32 1.0, %v183_v51  ;;  %v209_v57 = vadd.f32 0.05243302, %v208_v52 }
  0xc7   :  { %v173_v7 = vadd.f32 1.1283791, %v172_v1 }
  0xc8   :  { %v221_v55 = vmul.f32 %v220_v53, %v203_v30  ;;  %448 = vrcp.f32 %v184_v54  ;;  %v210_v61 = vmul.f32 %v209_v57, %v203_v30  ;;  %v196_v4 = vand.u32 2147483648, %v184_v54 }
  0xc9   :  { %v194_v6 = vand.u32 2147483647, %v184_v54  ;;  %vm190_vm1 = vweird.f32 %v184_v54  ;;  %v174_v16 = vmul.f32 %v173_v7, %v607_v13 }
  0xca   :  { %v222_v58 = vadd.f32 0.4994258, %v221_v55  ;;  %v211_v2 = vadd.f32 0.18741608, %v210_v61  ;;  %v197_v11 = vor.u32 1.1754944e-38, %v196_v4 }
  0xcb   :  { %vm195_vm3 = vcmp.eq.f32.partialorder %v194_v6, 8.507059e+37 }
  0xcc   :  { %v223_v59 = vmul.f32 %v222_v58, %v203_v30  ;;  %v212_v9 = vmul.f32 %v211_v2, %v203_v30 }
  0xce   :  { %v224_v62 = vadd.f32 1.0, %v223_v59  ;;  %v449_v63 = vpop.eup %448  ;;  %v213_v19 = vadd.f32 1.1283791, %v212_v9 }
  0xcf   :  { %v186_v0 = vmul.f32 %v449_v63, %v184_v54  ;;  %vm191_vm0 = vweird.f32 %v449_v63 }
  0xd0   :  { %450 = vrcp.f32 %v224_v62  ;;  %vm192_vm2 = vmor %vm190_vm1, %vm191_vm0  ;;  %v236_v21 = vand.u32 2147483648, %v224_v62  ;;  %v234_v25 = vand.u32 2147483647, %v224_v62  ;;  %vm230_vm5 = vweird.f32 %v224_v62 }
  0xd1   :  { %v187_v3 = vsub.f32 1.0, %v186_v0  ;;  %v214_v28 = vmul.f32 %v213_v19, %v614_v24  ;;  %v447_v24 = vld [vmem:[%s632_s4] ss:$0 sm:$0xff] }
  0xd2   :  { %v237_v27 = vor.u32 1.1754944e-38, %v236_v21  ;;  %vm235_vm7 = vcmp.eq.f32.partialorder %v234_v25, 8.507059e+37 }
  0xd3   :  { %v188_v5 = vmul.f32 %v449_v63, %v187_v3 }
  0xd5   :  { %v189_v10 = vadd.f32 %v449_v63, %v188_v5 }
  0xd6   :  { %v451_v8 = vpop.eup %450 }
  0xd7   :  { %v226_v14 = vmul.f32 %v451_v8, %v224_v62  ;;  %v193_v15 = vsel %vm192_vm2, %v449_v63, %v189_v10  ;;  %vm231_vm4 = vweird.f32 %v451_v8 }
  0xd8   :  { %v198_v18 = vsel %vm195_vm3, %v197_v11, %v193_v15  ;;  %vm232_vm6 = vmor %vm230_vm5, %vm231_vm4 }
  0xd9   :  { %v227_v17 = vsub.f32 1.0, %v226_v14  ;;  %v199_v22 = vmul.f32 %v198_v18, %v174_v16 }
  0xdb   :  { %v228_v23 = vmul.f32 %v451_v8, %v227_v17  ;;  %v387_v29 = vclamps-f32 %v199_v22, 1.0 }
  0xdd   :  { %v229_v26 = vadd.f32 %v451_v8, %v228_v23  ;;  %v242_v33 = vadd.f32 1.0, %v387_v29 }
  0xdf   :  { %v233_v30 = vsel %vm232_vm6, %v451_v8, %v229_v26  ;;  %v244_v37 = vmul.f32 %v242_v33, %v158_v34 }
  0xe0   :  { %v238_v31 = vsel %vm235_vm7, %v237_v27, %v233_v30 }
  0xe1   :  { %v239_v32 = vmul.f32 %v238_v31, %v214_v28 }
  0xe3   :  { %v388_v13 = vclamps-f32 %v239_v32, 1.0 }
  0xe5   :  { %v243_v36 = vadd.f32 1.0, %v388_v13 }
  0xe7   :  { %v245_v38 = vmul.f32 %v243_v36, %v159_v35 }
  0xe9   :  { %v246_v39 = vpack.c.bf16 %v245_v38, %v244_v37 }
  0xeb   :  { %323 = vmatmul.bf16.vlgmr.msra.gmra.mxu1 %v246_v39 }
 0x168   :  { %v324_v40 = vpop.f32.mrf.mxu1 }
 0x169   :  { %v325_v41 = vadd.f32 %v447_v24, %v324_v40 }
 0x16b   :  { %329 = vst [vmem:[#allocation8] sm:$0xff] %v325_v41 }
 0x170   :  { %v326_v12 = vpop.f32.mrf.mxu1 }
 0x171   :  { %v327_v20 = vadd.f32 %v447_v24, %v326_v12 }
 0x173   :  { %330 = vst [vmem:[#allocation8 + $0x8] sm:$0xff] %v327_v20 }
 0x174   :  { %343 = dma.vmem_to_hbm [thread:$0]  %s336_s11, 256, %s338_s14, [#allocation4], %s560_s15, %s560_s15, %s561_s16  }
 0x175   :  { %552 = dma.done.wait [#allocation4], 256  }
 0x176   :  { %553 = vsyncadd [#allocation4], 4294967040 }
 0x177   :  { %348 = vsyncpa [#allocation3], 1 }
 0x178   :  { %349 = vsyncpa [#allocation6], 1 }
 0x179   :  { %350 = vsyncpa [#allocation4], 1 }

</bundles_post_ra>
